<compile_context>
chip_gen: v5e
topology: v5e:2x2
jax: 0.10.0
libtpu: 0.0.40
codegen_flags: <defaults>
</compile_context>

<pallas_src>
import functools

import jax
import jax.numpy as jnp
from jax.experimental import pallas as pl
from jax.experimental.pallas import tpu as pltpu


def _round_up(n, m):
    return ((n + m - 1) // m) * m


def _mlp_kernel(x_ref, w1_ref, b1_ref, w2t_ref, b2_ref, o_ref):
    # Hidden layer: [tm, F] @ [F, Hp] on the MXU, bias + ReLU on the VPU.
    h = jnp.dot(x_ref[...], w1_ref[...], preferred_element_type=jnp.float32)
    h = jnp.maximum(h + b1_ref[...], 0.0)          # b1 is [1, Hp], broadcasts
    out_cols = o_ref.shape[-1]
    if out_cols == 1:
        # Single output column: VPU multiply by the W2 column (stored as a
        # [1, Hp] row) + XLU lane-reduce -> [tm, 1].  Skips a second MXU pass
        # whose N dimension would be 1.
        y = jnp.sum(h * w2t_ref[...], axis=-1, keepdims=True)
    else:
        # General path (unused for this module): h @ W2 with W2 stored
        # transposed as [O, Hp].
        y = jax.lax.dot_general(
            h, w2t_ref[...],
            dimension_numbers=(((1,), (1,)), ((), ())),
            preferred_element_type=jnp.float32)
    o_ref[...] = (y + b2_ref[...]).astype(o_ref.dtype)


def prepare_params(w1, b1, w2, b2):
    """One-time parameter prep (hoisted out of the per-call forward).

    w1: [F, H]  (PyTorch hidden.weight.T)      -> w1p  [F, Hp]
    b1: [1, H]                                  -> b1p  [1, Hp]
    w2: [H, O]  (PyTorch predict.weight.T)      -> w2tp [O, Hp]  (transposed)
    b2: [1, O]                                  -> b2p  [1, O]
    Hidden dim zero-padded 100 -> 128 so the hidden activation is exactly
    lane-aligned; zero pad keeps the math identical through bias+ReLU and the
    zero W2 lanes.
    """
    F, H = w1.shape
    O = w2.shape[1]
    Hp = _round_up(H, 128)
    w1p = jnp.zeros((F, Hp), jnp.float32).at[:, :H].set(w1.astype(jnp.float32))
    b1p = jnp.zeros((1, Hp), jnp.float32).at[:, :H].set(
        jnp.reshape(b1, (1, H)).astype(jnp.float32))
    w2tp = jnp.zeros((O, Hp), jnp.float32).at[:, :H].set(
        w2.astype(jnp.float32).T)
    b2p = jnp.reshape(b2, (1, O)).astype(jnp.float32)
    return w1p, b1p, w2tp, b2p


@functools.partial(jax.jit, static_argnames=("block_b",))
def net_forward(x, w1p, b1p, w2tp, b2p, *, block_b=1024):
    """Pallas forward pass of the 2-layer MLP.

    x: [B, F] float32; params pre-padded by `prepare_params`.
    Returns [B, O] float32 (O = real output width, no padding).
    """
    B, F = x.shape
    Hp = w1p.shape[1]
    O = w2tp.shape[0]
    x = x.astype(jnp.float32)

    # Batch tile: multiple of 8 sublanes, large (amortize per-step overhead),
    # but capped near B/2 so the grid keeps >= 2 independent steps and both
    # v7x TensorCores get work.  VMEM is nowhere near binding at these sizes.
    tm = min(_round_up(block_b, 8), _round_up(pl.cdiv(B, 2), 8))
    tm = max(tm, 8)
    grid = (pl.cdiv(B, tm),)

    # Advisory cost hint for XLA's scheduler around the custom call.
    cost = pl.CostEstimate(
        flops=2 * B * F * Hp + 2 * B * Hp * O,
        transcendentals=0,
        bytes_accessed=4 * (B * F + F * Hp + Hp + O * Hp + O + B * O),
    )

    return pl.pallas_call(
        _mlp_kernel,
        out_shape=jax.ShapeDtypeStruct((B, O), jnp.float32),
        grid=grid,
        in_specs=[
            pl.BlockSpec((tm, F), lambda i: (i, 0)),    # x streams over batch
            pl.BlockSpec((F, Hp), lambda i: (0, 0)),    # weights VMEM-resident
            pl.BlockSpec((1, Hp), lambda i: (0, 0)),
            pl.BlockSpec((O, Hp), lambda i: (0, 0)),
            pl.BlockSpec((1, O), lambda i: (0, 0)),
        ],
        out_specs=pl.BlockSpec((tm, O), lambda i: (i, 0)),  # real-width output
        compiler_params=pltpu.CompilerParams(
            dimension_semantics=("parallel",),  # batch tiles independent
        ),
        cost_estimate=cost,
    )(x, w1p, b1p, w2tp, b2p)


def init_params(key, n_feature, size_hidden, n_output):
    """Deterministic init mimicking torch.nn.Linear default U(-1/sqrt(in), 1/sqrt(in))."""
    k1, k2, k3, k4 = jax.random.split(key, 4)
    bound1 = 1.0 / jnp.sqrt(jnp.float32(n_feature))
    bound2 = 1.0 / jnp.sqrt(jnp.float32(size_hidden))
    w1 = jax.random.uniform(k1, (n_feature, size_hidden), jnp.float32, -bound1, bound1)
    b1 = jax.random.uniform(k2, (1, size_hidden), jnp.float32, -bound1, bound1)
    w2 = jax.random.uniform(k3, (size_hidden, n_output), jnp.float32, -bound2, bound2)
    b2 = jax.random.uniform(k4, (1, n_output), jnp.float32, -bound2, bound2)
    return w1, b1, w2, b2


def _reference(x, w1, b1, w2, b2):
    return jnp.maximum(x @ w1 + b1, 0.0) @ w2 + b2


if __name__ == "__main__":
    # Boston-housing-style shapes: 13 features, hidden=100, output=1.
    n_feature = 13      # cols
    size_hidden = 100
    n_output = 1

    key = jax.random.PRNGKey(0)
    kx, kp, kx2 = jax.random.split(key, 3)
    w1, b1, w2, b2 = init_params(kp, n_feature, size_hidden, n_output)

    # One-time parameter prep (padding hoisted out of the forward pass).
    w1p, b1p, w2tp, b2p = prepare_params(w1, b1, w2, b2)

    # Small batch (the spec's shapes) — single grid step.
    batch = 8
    x = jax.random.normal(kx, (batch, n_feature), jnp.float32)
    out = jax.block_until_ready(net_forward(x, w1p, b1p, w2tp, b2p))
    ref = _reference(x, w1, b1, w2, b2)
    assert out.shape == (batch, n_output)
    assert jnp.allclose(out, ref, atol=1e-5, rtol=1e-5)

    # Larger, non-aligned batch — exercises the multi-step grid and the
    # ragged final block (no materialized x padding).
    batch2 = 1000
    x2 = jax.random.normal(kx2, (batch2, n_feature), jnp.float32)
    out2 = jax.block_until_ready(net_forward(x2, w1p, b1p, w2tp, b2p))
    ref2 = _reference(x2, w1, b1, w2, b2)
    assert out2.shape == (batch2, n_output)
    assert jnp.allclose(out2, ref2, atol=1e-4, rtol=1e-4)

    # Smaller tile path (more grid steps) for coverage.
    out3 = jax.block_until_ready(net_forward(x2, w1p, b1p, w2tp, b2p, block_b=256))
    assert jnp.allclose(out3, ref2, atol=1e-4, rtol=1e-4)

    print("KERNEL_OK")
</pallas_src>

<mosaic_0001>
module attributes {stable_mosaic.version = 11 : i64} {
  func.func @_mlp_kernel(%arg0: i32, %arg1: memref<8x13xf32, #tpu.memory_space<vmem>>, %arg2: memref<13x128xf32, #tpu.memory_space<vmem>>, %arg3: memref<1x128xf32, #tpu.memory_space<vmem>>, %arg4: memref<1x128xf32, #tpu.memory_space<vmem>>, %arg5: memref<1x1xf32, #tpu.memory_space<vmem>>, %arg6: memref<8x1xf32, #tpu.memory_space<vmem>>) attributes {dimension_semantics = [#tpu.dimension_semantics<parallel>], iteration_bounds = array<i64: 1>, scalar_prefetch = 0 : i64, scratch_operands = 0 : i64, tpu.core_type = #tpu.core_type<tc>, window_params = [{transform_indices = @transform_0, window_bounds = array<i64: 8, 13>}, {pipeline_mode = #tpu.pipeline_mode<synchronous>, transform_indices = @transform_1, window_bounds = array<i64: 13, 128>}, {pipeline_mode = #tpu.pipeline_mode<synchronous>, transform_indices = @transform_2, window_bounds = array<i64: 1, 128>}, {pipeline_mode = #tpu.pipeline_mode<synchronous>, transform_indices = @transform_3, window_bounds = array<i64: 1, 128>}, {pipeline_mode = #tpu.pipeline_mode<synchronous>, transform_indices = @transform_4, window_bounds = array<i64: 1, 1>}, {transform_indices = @transform_5, window_bounds = array<i64: 8, 1>}]} {
    %c0 = arith.constant 0 : index
    %c0_0 = arith.constant 0 : index
    %0 = vector.load %arg1[%c0, %c0_0] : memref<8x13xf32, #tpu.memory_space<vmem>>, vector<8x13xf32>
    %c0_1 = arith.constant 0 : index
    %c0_2 = arith.constant 0 : index
    %1 = vector.load %arg2[%c0_1, %c0_2] : memref<13x128xf32, #tpu.memory_space<vmem>>, vector<13x128xf32>
    %cst = arith.constant dense<0.000000e+00> : vector<8x128xf32>
    %2 = tpu.matmul %0, %1, %cst {dimension_numbers = #tpu.dot_dimension_numbers<[1], [0], [0], [1], [0, 0, 1, 1], [], []>} : vector<8x13xf32>, vector<13x128xf32>, vector<8x128xf32> -> vector<8x128xf32>
    %c0_3 = arith.constant 0 : index
    %c0_4 = arith.constant 0 : index
    %3 = vector.load %arg3[%c0_3, %c0_4] : memref<1x128xf32, #tpu.memory_space<vmem>>, vector<1x128xf32>
    %4 = vector.broadcast %3 : vector<1x128xf32> to vector<8x128xf32>
    %5 = arith.addf %2, %4 : vector<8x128xf32>
    %cst_5 = arith.constant 0.000000e+00 : f32
    %6 = vector.broadcast %cst_5 : f32 to vector<8x128xf32>
    %7 = arith.maximumf %5, %6 : vector<8x128xf32>
    %c0_6 = arith.constant 0 : index
    %c0_7 = arith.constant 0 : index
    %8 = vector.load %arg4[%c0_6, %c0_7] : memref<1x128xf32, #tpu.memory_space<vmem>>, vector<1x128xf32>
    %9 = vector.broadcast %8 : vector<1x128xf32> to vector<8x128xf32>
    %10 = arith.mulf %7, %9 : vector<8x128xf32>
    %cst_8 = arith.constant dense<0.000000e+00> : vector<8xf32>
    %11 = vector.multi_reduction <add>, %10, %cst_8 [1] : vector<8x128xf32> to vector<8xf32>
    %12 = vector.shape_cast %11 : vector<8xf32> to vector<8x1xf32>
    %c0_9 = arith.constant 0 : index
    %c0_10 = arith.constant 0 : index
    %13 = vector.load %arg5[%c0_9, %c0_10] : memref<1x1xf32, #tpu.memory_space<vmem>>, vector<1x1xf32>
    %14 = vector.broadcast %13 : vector<1x1xf32> to vector<8x1xf32>
    %15 = arith.addf %12, %14 : vector<8x1xf32>
    %c0_11 = arith.constant 0 : index
    %c0_12 = arith.constant 0 : index
    %16 = vector.load %arg6[%c0_11, %c0_12] : memref<8x1xf32, #tpu.memory_space<vmem>>, vector<8x1xf32>
    tpu.vector_store %arg6[%c0_11, %c0_12], %15 {strides = array<i32>} : memref<8x1xf32, #tpu.memory_space<vmem>>, vector<8x1xf32>,
    return
  }
  func.func @transform_0(%arg0: i32) -> (i32, i32) {
    %c0_i32 = arith.constant 0 : i32
    %c0_i32_0 = arith.constant 0 : i32
    return %arg0, %c0_i32 : i32, i32
  }
  func.func @transform_1(%arg0: i32) -> (i32, i32) {
    %c0_i32 = arith.constant 0 : i32
    %c0_i32_0 = arith.constant 0 : i32
    %c0_i32_1 = arith.constant 0 : i32
    return %c0_i32, %c0_i32_0 : i32, i32
  }
  func.func @transform_2(%arg0: i32) -> (i32, i32) {
    %c0_i32 = arith.constant 0 : i32
    %c0_i32_0 = arith.constant 0 : i32
    %c0_i32_1 = arith.constant 0 : i32
    return %c0_i32, %c0_i32_0 : i32, i32
  }
  func.func @transform_3(%arg0: i32) -> (i32, i32) {
    %c0_i32 = arith.constant 0 : i32
    %c0_i32_0 = arith.constant 0 : i32
    %c0_i32_1 = arith.constant 0 : i32
    return %c0_i32, %c0_i32_0 : i32, i32
  }
  func.func @transform_4(%arg0: i32) -> (i32, i32) {
    %c0_i32 = arith.constant 0 : i32
    %c0_i32_0 = arith.constant 0 : i32
    %c0_i32_1 = arith.constant 0 : i32
    return %c0_i32, %c0_i32_0 : i32, i32
  }
  func.func @transform_5(%arg0: i32) -> (i32, i32) {
    %c0_i32 = arith.constant 0 : i32
    %c0_i32_0 = arith.constant 0 : i32
    return %arg0, %c0_i32 : i32, i32
  }
}

</mosaic_0001>

<bundles_post_ra>
// kernel: net_forward.1
= control target key start
LH: loop header
LB: loop body
LE: loop exit
PB: predicated region body
PF: predicated region fallthrough
CT: control target
= control target key end

     0   :  { %s221_s0 = inlined_call_operand.hbm [shape: f32[8,13], index: 0, kind: input, shape index: {}]   ;;  %s222_s1 = inlined_call_operand.hbm [shape: f32[13,128], index: 1, kind: input, shape index: {}]   ;;  %s223_s2 = inlined_call_operand.vmem [shape: f32[1,128], index: 2, kind: input, shape index: {}]   ;;  %s224_s3 = inlined_call_operand.vmem [shape: f32[1,128], index: 3, kind: input, shape index: {}]   ;;  %s225_s4 = inlined_call_operand.<no memory space> [shape: f32[1,1], index: 4, kind: input, shape index: {}]   ;;  %s226_s5 = inlined_call_operand.vmem [shape: f32[8,1], index: 5, kind: output, shape index: {}]  }
   0x1   :  { %v10_v0 = vstv %s225_s4 }
   0x2   :  { %11 = vst [vmem:[#allocation2] sm:$0x1] %v10_v0 }
   0x3   :  { %12 = vsyncpa [#allocation4], 0  ;;  %s19_s22 = sshll.u32 %s221_s0, 4  ;;  %s20_s22 = int_to_ptr.hbm [resolvable:$true] %s19_s22 }
   0x4   :  { %13 = vsyncpa [#allocation6], 0  ;;  %s169_s23 = smov [#allocation3]   ;;  %s29_s27 = sshll.u32 %s222_s1, 4  ;;  %s30_s27 = int_to_ptr.hbm [resolvable:$true] %s29_s27 }
   0x5   :  { %s21_s24 = sshll.u32 %s169_s23, 4  ;;  %s170_s28 = smov [#allocation5]   ;;  %s22_s24 = int_to_ptr.vmem [resolvable:$true] %s21_s24 }
   0x6   :  { %24 = dma.hbm_to_vmem [thread:$0]  %s20_s22, 128, %s22_s24, [#allocation4]  }
   0x7   :  { %s31_s29 = sshll.u32 %s170_s28, 4  ;;  %s171_s4 = smov 128   ;;  %s32_s29 = int_to_ptr.vmem [resolvable:$true] %s31_s29 }
   0x8   :  { %s172_s30 = smov 8  }
   0x9   :  { %37 = dma.hbm_to_vmem [thread:$0]  %s30_s27, 256, %s32_s29, [#allocation6], %s171_s4, %s171_s4, %s172_s30  }
   0xa   :  { %165 = dma.done.wait [#allocation4], 128  }
   0xb   :  { %166 = vsyncadd [#allocation4], 4294967168 }
   0xc   :  { %167 = dma.done.wait [#allocation6], 256  }
   0xd   :  { %168 = vsyncadd [#allocation6], 4294967040  ;;  %vm63_vm0 = vcmask 1044480   ;;  %v54_v1 = vld [vmem:[#allocation5 + $0x8] sm:$0x1f]  ;;  %v53_v2 = vld [vmem:[#allocation5] sm:$0xff] }
   0xe   :  { %108 = vmatpush.msk.msra.mxu0 %vm63_vm0, %v54_v1  ;;  %v52_v3 = vld [vmem:[#allocation3] sm:$0xff]  ;;  %vm59_vm1 = vcmask 105472   ;;  %v114_v4 = vld [vmem:[%s223_s2] ss:$0 sm:$0xff]  ;;  %vm100_vm2 = vcmask 7168  }
   0xf   :  { %v115_v7 = vld [vmem:[%s224_s3] ss:$0 sm:$0xff] }
  0x10   :  { %82 = vmatpush.msra.mxu0 %v53_v2  ;;  %v116_v10 = vld [vmem:[#allocation2] ss:$0 sm:$0xff] }
  0x11   :  { %109 = vmatmul.msk.f32.vlgmr.msra.gmra.mxu0 %vm59_vm1, %v52_v3 }
  0x8e   :  { %v84_v5 = vpop.f32.mrf.mxu0 }
  0x8f   :  { %v85_v6 = vadd.f32 %v114_v4, %v84_v5 }
  0x91   :  { %v87_v8 = vmax.f32 %v85_v6, 0.0 }
  0x93   :  { %v92_v9 = vmul.f32 %v115_v7, %v87_v8 }
  0x95   :  { %93 = vadd.xlane.f32.xlu0 %v92_v9 }
 0x108   :  { %v94_v11 = vpop.xlane.xlu0 %93 }
 0x109   :  { %v99_v12 = vadd.f32 %v116_v10, %v94_v11 }
 0x10b   :  { %101 = vst.msk [vmem:[%s226_s5] sm:$0xff] %vm100_vm2, %v99_v12 }
 0x10c   :  { %106 = vsyncpa [#allocation4], 1 }
 0x10d   :  { %107 = vsyncpa [#allocation6], 1 }

</bundles_post_ra>
